<compile_context>
chip_gen: v7x
topology: tpu7x:2x2x1
jax: 0.10.0
libtpu: 0.0.40
codegen_flags: <defaults>
</compile_context>

<pallas_src>
import jax
import jax.numpy as jnp
from jax.experimental import pallas as pl
from jax.experimental.pallas import tpu as pltpu


# ----------------------------------------------------------------------------
# Pallas kernel: full CCALayer for a block of `nb` batch elements.
# ----------------------------------------------------------------------------
def _make_cca_kernel(inv_hw):
    """inv_hw = 1 / (H*W) using the TRUE (unpadded) spatial size."""

    def kernel(x_ref, w1t_ref, b1_ref, w2_ref, b2_ref, o_ref):
        # x_ref: (nb, C, HWp)  lane axis = padded spatial
        x = x_ref[...].astype(jnp.float32)

        # one-pass per-channel statistics (padded lanes are zero -> exact)
        mean = jnp.sum(x, axis=-1, keepdims=True) * inv_hw          # (nb, C, 1)
        msq = jnp.sum(x * x, axis=-1, keepdims=True) * inv_hw       # (nb, C, 1)
        var = jnp.maximum(msq - mean * mean, 0.0)                   # clamp >= 0
        y = jnp.sqrt(var) + mean                                    # (nb, C, 1)

        # squeeze: h[n, cr] = relu(sum_c W1[cr, c] * y[n, c] + b1[cr])
        w1t = w1t_ref[...]                                          # (C, Cr)
        h = jnp.sum(w1t[None, :, :] * y, axis=1, keepdims=True)     # (nb, 1, Cr)
        h = jnp.maximum(h + b1_ref[...][None, :, :], 0.0)

        # excite: g[n, c] = sigmoid(sum_cr W2[c, cr] * h[n, cr] + b2[c])
        w2 = w2_ref[...]                                            # (C, Cr)
        g = jnp.sum(w2[None, :, :] * h, axis=2, keepdims=True)      # (nb, C, 1)
        g = jax.nn.sigmoid(g + b2_ref[...][None, :, :])

        # per-channel gating, lane-dense store in the input dtype
        o_ref[...] = (x * g).astype(o_ref.dtype)

    return kernel


# ----------------------------------------------------------------------------
# Wrapper
# ----------------------------------------------------------------------------
def _tensorcores_per_device():
    """Best-effort: 2 TensorCores per device on v4/v7-class chips, else 1."""
    try:
        kind = jax.devices()[0].device_kind.lower()
    except Exception:  # pragma: no cover - be conservative if query fails
        return 1
    return 2 if ("v7" in kind or "v4" in kind) else 1


def cca_forward(x_nchw, params):
    N, C, H, W = x_nchw.shape
    HW = H * W
    HWp = max(128, pl.cdiv(HW, 128) * 128)          # lane-dense last dim

    x3 = x_nchw.reshape(N, C, HW)
    if HWp != HW:
        # zero padding is exact: sums ignore zeros, divisor uses true HW
        x3 = jnp.pad(x3, ((0, 0), (0, 0), (0, HWp - HW)))

    w1 = params["w1"][:, :, 0, 0]                   # (Cr, C)
    w2 = params["w2"][:, :, 0, 0]                   # (C, Cr)
    Cr = w1.shape[0]
    w1t = jnp.transpose(w1, (1, 0))                 # (C, Cr), tiny
    b1 = params["b1"].reshape(1, Cr)
    b2 = params["b2"].reshape(C, 1)

    # ---- choose the batch-block size -------------------------------------
    # * at least `cores` grid steps so v7x's 2 TCs both work (when N allows)
    # * otherwise as FEW steps as possible (amortize per-step overhead) while
    #   each block stays comfortably inside scoped VMEM.
    itemsize = jnp.dtype(x3.dtype).itemsize
    elem_bytes = C * HWp * itemsize                 # bytes per batch element
    MAX_BLOCK_BYTES = 4 << 20                       # block cap (x4 w/ dbl-buf in+out)
    cores = _tensorcores_per_device()
    steps_vmem = pl.cdiv(N * elem_bytes, MAX_BLOCK_BYTES)
    num_steps = min(N, max(min(cores, N), steps_vmem))
    nb = pl.cdiv(N, num_steps)
    while N % nb:                                   # make nb divide N exactly
        nb += 1
    grid_n = N // nb

    # raise the scoped-VMEM limit only when blocks are actually large
    vmem_needed = 4 * nb * elem_bytes + (1 << 20)   # in+out, double buffered
    cp_kwargs = dict(dimension_semantics=("parallel",))
    if vmem_needed > (16 << 20):
        cp_kwargs["vmem_limit_bytes"] = int(min(vmem_needed, 100 << 20))
    compiler_params = pltpu.CompilerParams(**cp_kwargs)

    kernel = _make_cca_kernel(1.0 / float(HW))

    out = pl.pallas_call(
        kernel,
        out_shape=jax.ShapeDtypeStruct((N, C, HWp), x3.dtype),
        grid=(grid_n,),
        in_specs=[
            pl.BlockSpec((nb, C, HWp), lambda n: (n, 0, 0)),
            pl.BlockSpec((C, Cr), lambda n: (0, 0)),
            pl.BlockSpec((1, Cr), lambda n: (0, 0)),
            pl.BlockSpec((C, Cr), lambda n: (0, 0)),
            pl.BlockSpec((C, 1), lambda n: (0, 0)),
        ],
        out_specs=pl.BlockSpec((nb, C, HWp), lambda n: (n, 0, 0)),
        compiler_params=compiler_params,
    )(x3, w1t, b1, w2, b2)

    if HWp != HW:
        out = out[:, :, :HW]
    return out.reshape(N, C, H, W)


# ----------------------------------------------------------------------------
# Pure-JAX reference (mirrors the PyTorch CCALayer)
# ----------------------------------------------------------------------------
def cca_reference(x, params):
    mean = jnp.mean(x, axis=(2, 3), keepdims=True)
    var = jnp.mean((x - mean) ** 2, axis=(2, 3), keepdims=True)
    y = jnp.sqrt(var) + mean                                   # (N, C, 1, 1)
    w1 = params["w1"][:, :, 0, 0]                              # (Cr, C)
    w2 = params["w2"][:, :, 0, 0]                              # (C, Cr)
    h = jnp.einsum("rc,ncij->nrij", w1, y) + params["b1"].reshape(1, -1, 1, 1)
    h = jax.nn.relu(h)
    g = jnp.einsum("cr,nrij->ncij", w2, h) + params["b2"].reshape(1, -1, 1, 1)
    return x * jax.nn.sigmoid(g)


def init_params(key, channel, reduction=16):
    cr = channel // reduction
    k1, k2, k3, k4 = jax.random.split(key, 4)
    return {
        "w1": 0.1 * jax.random.normal(k1, (cr, channel, 1, 1), jnp.float32),
        "b1": 0.05 * jax.random.normal(k2, (cr,), jnp.float32),
        "w2": 0.1 * jax.random.normal(k3, (channel, cr, 1, 1), jnp.float32),
        "b2": 0.05 * jax.random.normal(k4, (channel,), jnp.float32),
    }


if __name__ == "__main__":
    key = jax.random.PRNGKey(0)
    kx, kp = jax.random.split(key)
    N, C, H, W = 2, 64, 16, 16            # channel=64, reduction=16 -> hidden=4
    x = jax.random.normal(kx, (N, C, H, W), jnp.float32)
    params = init_params(kp, C, reduction=16)

    fwd = jax.jit(cca_forward)

    # f32 path
    out = jax.block_until_ready(fwd(x, params))
    ref = cca_reference(x, params)
    assert out.shape == x.shape and out.dtype == x.dtype
    err = float(jnp.max(jnp.abs(out - ref)))
    if err > 1e-4:
        raise AssertionError(f"Pallas CCALayer (f32) mismatch, max abs err = {err}")

    # bf16 I/O path (compute stays f32 in-kernel; only final store rounds)
    xb = x.astype(jnp.bfloat16)
    out_b = jax.block_until_ready(fwd(xb, params))
    assert out_b.dtype == jnp.bfloat16
    ref_b = cca_reference(xb.astype(jnp.float32), params)
    err_b = float(jnp.max(jnp.abs(out_b.astype(jnp.float32) - ref_b)))
    if err_b > 5e-2:
        raise AssertionError(f"Pallas CCALayer (bf16) mismatch, max abs err = {err_b}")

    # odd batch + non-multiple-of-128 spatial (exercises the lane-padding path)
    x2 = jax.random.normal(jax.random.PRNGKey(1), (3, C, 10, 10), jnp.float32)
    out2 = jax.block_until_ready(jax.jit(cca_forward)(x2, params))
    ref2 = cca_reference(x2, params)
    err2 = float(jnp.max(jnp.abs(out2 - ref2)))
    if err2 > 1e-4:
        raise AssertionError(f"Pallas CCALayer (padded HW) mismatch, max abs err = {err2}")

    print("KERNEL_OK")
</pallas_src>

<mosaic_0001>
module attributes {stable_mosaic.version = 11 : i64} {
  func.func @kernel(%arg0: i32, %arg1: memref<2x64x256xf32, #tpu.memory_space<vmem>>, %arg2: memref<64x4xf32, #tpu.memory_space<vmem>>, %arg3: memref<1x4xf32, #tpu.memory_space<vmem>>, %arg4: memref<64x4xf32, #tpu.memory_space<vmem>>, %arg5: memref<64x1xf32, #tpu.memory_space<vmem>>, %arg6: memref<2x64x256xf32, #tpu.memory_space<vmem>>) attributes {dimension_semantics = [#tpu.dimension_semantics<parallel>], iteration_bounds = array<i64: 1>, scalar_prefetch = 0 : i64, scratch_operands = 0 : i64, tpu.core_type = #tpu.core_type<tc>, window_params = [{transform_indices = @transform_0, window_bounds = array<i64: 2, 64, 256>}, {pipeline_mode = #tpu.pipeline_mode<synchronous>, transform_indices = @transform_1, window_bounds = array<i64: 64, 4>}, {pipeline_mode = #tpu.pipeline_mode<synchronous>, transform_indices = @transform_2, window_bounds = array<i64: 1, 4>}, {pipeline_mode = #tpu.pipeline_mode<synchronous>, transform_indices = @transform_3, window_bounds = array<i64: 64, 4>}, {pipeline_mode = #tpu.pipeline_mode<synchronous>, transform_indices = @transform_4, window_bounds = array<i64: 64, 1>}, {transform_indices = @transform_5, window_bounds = array<i64: 2, 64, 256>}]} {
    %c0 = arith.constant 0 : index
    %c0_0 = arith.constant 0 : index
    %c0_1 = arith.constant 0 : index
    %0 = vector.load %arg1[%c0, %c0_0, %c0_1] : memref<2x64x256xf32, #tpu.memory_space<vmem>>, vector<2x64x256xf32>
    %cst = arith.constant dense<0.000000e+00> : vector<2x64xf32>
    %1 = vector.multi_reduction <add>, %0, %cst [2] : vector<2x64x256xf32> to vector<2x64xf32>
    %2 = vector.shape_cast %1 : vector<2x64xf32> to vector<2x64x1xf32>
    %cst_2 = arith.constant 3.906250e-03 : f32
    %3 = vector.broadcast %cst_2 : f32 to vector<2x64x1xf32>
    %4 = arith.mulf %2, %3 : vector<2x64x1xf32>
    %5 = arith.mulf %0, %0 : vector<2x64x256xf32>
    %cst_3 = arith.constant dense<0.000000e+00> : vector<2x64xf32>
    %6 = vector.multi_reduction <add>, %5, %cst_3 [2] : vector<2x64x256xf32> to vector<2x64xf32>
    %7 = vector.shape_cast %6 : vector<2x64xf32> to vector<2x64x1xf32>
    %cst_4 = arith.constant 3.906250e-03 : f32
    %8 = vector.broadcast %cst_4 : f32 to vector<2x64x1xf32>
    %9 = arith.mulf %7, %8 : vector<2x64x1xf32>
    %10 = arith.mulf %4, %4 : vector<2x64x1xf32>
    %11 = arith.subf %9, %10 : vector<2x64x1xf32>
    %cst_5 = arith.constant 0.000000e+00 : f32
    %12 = vector.broadcast %cst_5 : f32 to vector<2x64x1xf32>
    %13 = arith.maximumf %11, %12 : vector<2x64x1xf32>
    %14 = math.sqrt %13 : vector<2x64x1xf32>
    %15 = arith.addf %14, %4 : vector<2x64x1xf32>
    %c0_6 = arith.constant 0 : index
    %c0_7 = arith.constant 0 : index
    %16 = vector.load %arg2[%c0_6, %c0_7] : memref<64x4xf32, #tpu.memory_space<vmem>>, vector<64x4xf32>
    %17 = vector.shape_cast %16 : vector<64x4xf32> to vector<1x64x4xf32>
    %18 = vector.broadcast %17 : vector<1x64x4xf32> to vector<2x64x4xf32>
    %19 = vector.broadcast %15 : vector<2x64x1xf32> to vector<2x64x4xf32>
    %20 = arith.mulf %18, %19 : vector<2x64x4xf32>
    %cst_8 = arith.constant dense<0.000000e+00> : vector<2x4xf32>
    %21 = vector.multi_reduction <add>, %20, %cst_8 [1] : vector<2x64x4xf32> to vector<2x4xf32>
    %22 = vector.shape_cast %21 : vector<2x4xf32> to vector<2x1x4xf32>
    %c0_9 = arith.constant 0 : index
    %c0_10 = arith.constant 0 : index
    %23 = vector.load %arg3[%c0_9, %c0_10] : memref<1x4xf32, #tpu.memory_space<vmem>>, vector<1x4xf32>
    %24 = vector.shape_cast %23 : vector<1x4xf32> to vector<1x1x4xf32>
    %25 = vector.broadcast %24 : vector<1x1x4xf32> to vector<2x1x4xf32>
    %26 = arith.addf %22, %25 : vector<2x1x4xf32>
    %cst_11 = arith.constant 0.000000e+00 : f32
    %27 = vector.broadcast %cst_11 : f32 to vector<2x1x4xf32>
    %28 = arith.maximumf %26, %27 : vector<2x1x4xf32>
    %c0_12 = arith.constant 0 : index
    %c0_13 = arith.constant 0 : index
    %29 = vector.load %arg4[%c0_12, %c0_13] : memref<64x4xf32, #tpu.memory_space<vmem>>, vector<64x4xf32>
    %30 = vector.shape_cast %29 : vector<64x4xf32> to vector<1x64x4xf32>
    %31 = vector.broadcast %30 : vector<1x64x4xf32> to vector<2x64x4xf32>
    %32 = vector.broadcast %28 : vector<2x1x4xf32> to vector<2x64x4xf32>
    %33 = arith.mulf %31, %32 : vector<2x64x4xf32>
    %cst_14 = arith.constant dense<0.000000e+00> : vector<2x64xf32>
    %34 = vector.multi_reduction <add>, %33, %cst_14 [2] : vector<2x64x4xf32> to vector<2x64xf32>
    %35 = vector.shape_cast %34 : vector<2x64xf32> to vector<2x64x1xf32>
    %c0_15 = arith.constant 0 : index
    %c0_16 = arith.constant 0 : index
    %36 = vector.load %arg5[%c0_15, %c0_16] : memref<64x1xf32, #tpu.memory_space<vmem>>, vector<64x1xf32>
    %37 = vector.shape_cast %36 : vector<64x1xf32> to vector<1x64x1xf32>
    %38 = vector.broadcast %37 : vector<1x64x1xf32> to vector<2x64x1xf32>
    %39 = arith.addf %35, %38 : vector<2x64x1xf32>
    %40 = arith.negf %39 : vector<2x64x1xf32>
    %41 = math.exp %40 : vector<2x64x1xf32>
    %cst_17 = arith.constant 1.000000e+00 : f32
    %42 = vector.broadcast %cst_17 : f32 to vector<2x64x1xf32>
    %43 = arith.addf %42, %41 : vector<2x64x1xf32>
    %44 = arith.divf %42, %43 : vector<2x64x1xf32>
    %45 = vector.broadcast %44 : vector<2x64x1xf32> to vector<2x64x256xf32>
    %46 = arith.mulf %0, %45 : vector<2x64x256xf32>
    %c0_18 = arith.constant 0 : index
    %c0_19 = arith.constant 0 : index
    %c0_20 = arith.constant 0 : index
    %47 = vector.load %arg6[%c0_18, %c0_19, %c0_20] : memref<2x64x256xf32, #tpu.memory_space<vmem>>, vector<2x64x256xf32>
    tpu.vector_store %arg6[%c0_18, %c0_19, %c0_20], %46 {strides = array<i32>} : memref<2x64x256xf32, #tpu.memory_space<vmem>>, vector<2x64x256xf32>,
    return
  }
  func.func @transform_0(%arg0: i32) -> (i32, i32, i32) {
    %c0_i32 = arith.constant 0 : i32
    %c0_i32_0 = arith.constant 0 : i32
    %c0_i32_1 = arith.constant 0 : i32
    return %arg0, %c0_i32, %c0_i32_0 : i32, i32, i32
  }
  func.func @transform_1(%arg0: i32) -> (i32, i32) {
    %c0_i32 = arith.constant 0 : i32
    %c0_i32_0 = arith.constant 0 : i32
    %c0_i32_1 = arith.constant 0 : i32
    return %c0_i32, %c0_i32_0 : i32, i32
  }
  func.func @transform_2(%arg0: i32) -> (i32, i32) {
    %c0_i32 = arith.constant 0 : i32
    %c0_i32_0 = arith.constant 0 : i32
    %c0_i32_1 = arith.constant 0 : i32
    return %c0_i32, %c0_i32_0 : i32, i32
  }
  func.func @transform_3(%arg0: i32) -> (i32, i32) {
    %c0_i32 = arith.constant 0 : i32
    %c0_i32_0 = arith.constant 0 : i32
    %c0_i32_1 = arith.constant 0 : i32
    return %c0_i32, %c0_i32_0 : i32, i32
  }
  func.func @transform_4(%arg0: i32) -> (i32, i32) {
    %c0_i32 = arith.constant 0 : i32
    %c0_i32_0 = arith.constant 0 : i32
    %c0_i32_1 = arith.constant 0 : i32
    return %c0_i32, %c0_i32_0 : i32, i32
  }
  func.func @transform_5(%arg0: i32) -> (i32, i32, i32) {
    %c0_i32 = arith.constant 0 : i32
    %c0_i32_0 = arith.constant 0 : i32
    %c0_i32_1 = arith.constant 0 : i32
    return %arg0, %c0_i32, %c0_i32_0 : i32, i32, i32
  }
}

</mosaic_0001>

<bundles_post_ra>
// kernel: cca_forward.1
= control target key start
LH: loop header
LB: loop body
LE: loop exit
PB: predicated region body
PF: predicated region fallthrough
CT: control target
= control target key end

     0   :  { %vm412_vm9 = vcmask 31744   ;;  %s1629_s0 = inlined_call_operand.vmem [shape: f32[2,64,256], index: 0, kind: input, shape index: {}]   ;;  %s1630_s1 = inlined_call_operand.vmem [shape: f32[64,4], index: 1, kind: input, shape index: {}]   ;;  %s1631_s2 = inlined_call_operand.vmem [shape: f32[1,4], index: 2, kind: input, shape index: {}]   ;;  %s1632_s3 = inlined_call_operand.vmem [shape: f32[64,4], index: 3, kind: input, shape index: {}]   ;;  %s1633_s4 = inlined_call_operand.vmem [shape: f32[64,1], index: 4, kind: input, shape index: {}]   ;;  %s1634_s5 = inlined_call_operand.vmem [shape: f32[2,64,256], index: 5, kind: output, shape index: {}]  }
   0x1   :  { %v36_v0 = vld [vmem:[%s1629_s0 + $0x80] sm:$0xff]  ;;  %v37_v1 = vld [vmem:[%s1629_s0 + $0x88] sm:$0xff]  ;;  %v38_v5 = vld [vmem:[%s1629_s0 + $0x90] sm:$0xff] }
   0x2   :  { %v20_v2 = vld [vmem:[%s1629_s0] sm:$0xff]  ;;  %v76_v3 = vadd.f32 %v37_v1, %v36_v0  ;;  %v21_v4 = vld [vmem:[%s1629_s0 + $0x8] sm:$0xff]  ;;  %v39_v6 = vld [vmem:[%s1629_s0 + $0x98] sm:$0xff]  ;;  %v134_v23 = vmul.f32 %v38_v5, %v38_v5  ;;  %v132_v26 = vmul.f32 %v36_v0, %v36_v0  ;;  %v133_v27 = vmul.f32 %v37_v1, %v37_v1 }
   0x3   :  { %v52_v7 = vadd.f32 %v21_v4, %v20_v2  ;;  %v22_v8 = vld [vmem:[%s1629_s0 + $0x10] sm:$0xff]  ;;  %v23_v9 = vld [vmem:[%s1629_s0 + $0x18] sm:$0xff]  ;;  %v79_v10 = vadd.f32 %v39_v6, %v38_v5  ;;  %v40_v12 = vld [vmem:[%s1629_s0 + $0xa0] sm:$0xff]  ;;  %v116_v20 = vmul.f32 %v20_v2, %v20_v2  ;;  %v117_v21 = vmul.f32 %v21_v4, %v21_v4 }
   0x4   :  { %77 = vadd.xlane.f32.xlu1 %v76_v3  ;;  %v55_v11 = vadd.f32 %v23_v9, %v22_v8  ;;  %v41_v13 = vld [vmem:[%s1629_s0 + $0xa8] sm:$0xff]  ;;  %v24_v14 = vld [vmem:[%s1629_s0 + $0x20] sm:$0xff]  ;;  %v118_v17 = vmul.f32 %v22_v8, %v22_v8  ;;  %v119_v18 = vmul.f32 %v23_v9, %v23_v9  ;;  %v135_v24 = vmul.f32 %v39_v6, %v39_v6  ;;  %v42_v30 = vld [vmem:[%s1629_s0 + $0xb0] sm:$0xff] }
   0x5   :  { %53 = vadd.xlane.f32.xlu0 %v52_v7  ;;  %v25_v15 = vld [vmem:[%s1629_s0 + $0x28] sm:$0xff]  ;;  %v82_v16 = vadd.f32 %v41_v13, %v40_v12  ;;  %v148_v25 = vadd.f32 %v117_v21, %v116_v20  ;;  %v172_v29 = vadd.f32 %v133_v27, %v132_v26  ;;  %v43_v31 = vld [vmem:[%s1629_s0 + $0xb8] sm:$0xff]  ;;  %v26_v32 = vld [vmem:[%s1629_s0 + $0x30] sm:$0xff]  ;;  %v136_v35 = vmul.f32 %v40_v12, %v40_v12 }
   0x6   :  { %v58_v19 = vadd.f32 %v25_v15, %v24_v14  ;;  %v151_v22 = vadd.f32 %v119_v18, %v118_v17  ;;  %v175_v28 = vadd.f32 %v135_v24, %v134_v23  ;;  %v27_v33 = vld [vmem:[%s1629_s0 + $0x38] sm:$0xff]  ;;  %v85_v34 = vadd.f32 %v43_v31, %v42_v30  ;;  %v44_v42 = vld [vmem:[%s1629_s0 + $0xc0] sm:$0xff]  ;;  %v45_v43 = vld [vmem:[%s1629_s0 + $0xc8] sm:$0xff] }
   0x7   :  { %v137_v36 = vmul.f32 %v41_v13, %v41_v13  ;;  %v61_v37 = vadd.f32 %v27_v33, %v26_v32  ;;  %v120_v38 = vmul.f32 %v24_v14, %v24_v14  ;;  %v121_v39 = vmul.f32 %v25_v15, %v25_v15  ;;  %v28_v44 = vld [vmem:[%s1629_s0 + $0x40] sm:$0xff]  ;;  %v29_v45 = vld [vmem:[%s1629_s0 + $0x48] sm:$0xff]  ;;  %v46_v54 = vld [vmem:[%s1629_s0 + $0xd0] sm:$0xff] }
   0x8   :  { %80 = vadd.xlane.f32.xlu1 %v79_v10  ;;  %v88_v46 = vadd.f32 %v45_v43, %v44_v42  ;;  %v138_v47 = vmul.f32 %v42_v30, %v42_v30  ;;  %v139_v48 = vmul.f32 %v43_v31, %v43_v31  ;;  %v64_v49 = vadd.f32 %v29_v45, %v28_v44  ;;  %v47_v55 = vld [vmem:[%s1629_s0 + $0xd8] sm:$0xff]  ;;  %v30_v56 = vld [vmem:[%s1629_s0 + $0x50] sm:$0xff]  ;;  %v48_v2 = vld [vmem:[%s1629_s0 + $0xe0] sm:$0xff] }
   0x9   :  { %56 = vadd.xlane.f32.xlu0 %v55_v11  ;;  %v178_v40 = vadd.f32 %v137_v36, %v136_v35  ;;  %v154_v41 = vadd.f32 %v121_v39, %v120_v38  ;;  %v122_v50 = vmul.f32 %v26_v32, %v26_v32  ;;  %v123_v51 = vmul.f32 %v27_v33, %v27_v33  ;;  %v31_v57 = vld [vmem:[%s1629_s0 + $0x58] sm:$0xff]  ;;  %v49_v3 = vld [vmem:[%s1629_s0 + $0xe8] sm:$0xff]  ;;  %v32_v4 = vld [vmem:[%s1629_s0 + $0x60] sm:$0xff] }
   0xa   :  { %v181_v52 = vadd.f32 %v139_v48, %v138_v47  ;;  %v91_v58 = vadd.f32 %v47_v55, %v46_v54  ;;  %v140_v59 = vmul.f32 %v44_v42, %v44_v42  ;;  %v141_v60 = vmul.f32 %v45_v43, %v45_v43  ;;  %v33_v5 = vld [vmem:[%s1629_s0 + $0x68] sm:$0xff]  ;;  %v50_v14 = vld [vmem:[%s1629_s0 + $0xf0] sm:$0xff]  ;;  %v51_v15 = vld [vmem:[%s1629_s0 + $0xf8] sm:$0xff] }
   0xb   :  { %v157_v53 = vadd.f32 %v123_v51, %v122_v50  ;;  %v67_v61 = vadd.f32 %v31_v57, %v30_v56  ;;  %v124_v62 = vmul.f32 %v28_v44, %v28_v44  ;;  %v125_v63 = vmul.f32 %v29_v45, %v29_v45  ;;  %v35_v17 = vld [vmem:[%s1629_s0 + $0x78] sm:$0xff] }
   0xc   :  { %83 = vadd.xlane.f32.xlu1 %v82_v16  ;;  %v184_v0 = vadd.f32 %v141_v60, %v140_v59  ;;  %v94_v6 = vadd.f32 %v49_v3, %v48_v2  ;;  %v142_v7 = vmul.f32 %v46_v54, %v46_v54  ;;  %v143_v8 = vmul.f32 %v47_v55, %v47_v55  ;;  %v34_v16 = vld [vmem:[%s1629_s0 + $0x70] sm:$0xff] }
   0xd   :  { %59 = vadd.xlane.f32.xlu0 %v58_v19  ;;  %v160_v1 = vadd.f32 %v125_v63, %v124_v62  ;;  %v70_v9 = vadd.f32 %v33_v5, %v32_v4  ;;  %v126_v10 = vmul.f32 %v30_v56, %v30_v56  ;;  %v127_v11 = vmul.f32 %v31_v57, %v31_v57 }
   0xe   :  { %v187_v12 = vadd.f32 %v143_v8, %v142_v7  ;;  %v97_v18 = vadd.f32 %v51_v15, %v50_v14  ;;  %v144_v19 = vmul.f32 %v48_v2, %v48_v2  ;;  %v145_v20 = vmul.f32 %v49_v3, %v49_v3 }
   0xf   :  { %v163_v13 = vadd.f32 %v127_v11, %v126_v10  ;;  %v73_v21 = vadd.f32 %v35_v17, %v34_v16  ;;  %v129_v23 = vmul.f32 %v33_v5, %v33_v5  ;;  %v147_v26 = vmul.f32 %v51_v15, %v51_v15 }
  0x10   :  { %152 = vadd.xlane.f32.xlu1 %v151_v22  ;;  %v128_v22 = vmul.f32 %v32_v4, %v32_v4  ;;  %v190_v24 = vadd.f32 %v145_v20, %v144_v19 }
  0x11   :  { %149 = vadd.xlane.f32.xlu0 %v148_v25  ;;  %v146_v25 = vmul.f32 %v50_v14, %v50_v14 }
  0x12   :  { %v166_v27 = vadd.f32 %v129_v23, %v128_v22 }
  0x13   :  { %v193_v30 = vadd.f32 %v147_v26, %v146_v25 }
  0x14   :  { %176 = vadd.xlane.f32.xlu1 %v175_v28  ;;  %v130_v28 = vmul.f32 %v34_v16, %v34_v16 }
  0x15   :  { %173 = vadd.xlane.f32.xlu0 %v172_v29  ;;  %v131_v29 = vmul.f32 %v35_v17, %v35_v17 }
  0x17   :  { %v169_v31 = vadd.f32 %v131_v29, %v130_v28 }
  0x18   :  { %86 = vadd.xlane.f32.xlu1 %v85_v34 }
  0x19   :  { %62 = vadd.xlane.f32.xlu0 %v61_v37 }
  0x1c   :  { %179 = vadd.xlane.f32.xlu1 %v178_v40 }
  0x1d   :  { %155 = vadd.xlane.f32.xlu0 %v154_v41 }
  0x20   :  { %89 = vadd.xlane.f32.xlu1 %v88_v46 }
  0x21   :  { %65 = vadd.xlane.f32.xlu0 %v64_v49 }
  0x24   :  { %182 = vadd.xlane.f32.xlu1 %v181_v52 }
  0x25   :  { %158 = vadd.xlane.f32.xlu0 %v157_v53 }
  0x28   :  { %92 = vadd.xlane.f32.xlu1 %v91_v58 }
  0x29   :  { %68 = vadd.xlane.f32.xlu0 %v67_v61 }
  0x2c   :  { %185 = vadd.xlane.f32.xlu1 %v184_v0 }
  0x2d   :  { %161 = vadd.xlane.f32.xlu0 %v160_v1 }
  0x30   :  { %95 = vadd.xlane.f32.xlu1 %v94_v6 }
  0x31   :  { %71 = vadd.xlane.f32.xlu0 %v70_v9 }
  0x34   :  { %188 = vadd.xlane.f32.xlu1 %v187_v12 }
  0x35   :  { %164 = vadd.xlane.f32.xlu0 %v163_v13 }
  0x38   :  { %98 = vadd.xlane.f32.xlu1 %v97_v18 }
  0x39   :  { %74 = vadd.xlane.f32.xlu0 %v73_v21 }
  0x3c   :  { %191 = vadd.xlane.f32.xlu1 %v190_v24 }
  0x3d   :  { %167 = vadd.xlane.f32.xlu0 %v166_v27 }
  0x40   :  { %194 = vadd.xlane.f32.xlu1 %v193_v30 }
  0x41   :  { %170 = vadd.xlane.f32.xlu0 %v169_v31 }
  0x91   :  { %v78_v32 = vpop.xlane.xlu1 %77 }
  0x92   :  { %v54_v33 = vpop.xlane.xlu0 %53  ;;  %v1086_v41 = vmul.f32 0.00390625, %v78_v32 }
  0x93   :  { %v1084_v39 = vmul.f32 0.00390625, %v54_v33 }
  0x94   :  { %v220_v51 = vmul.f32 %v1086_v41, %v1086_v41 }
  0x95   :  { %v81_v34 = vpop.xlane.xlu1 %80  ;;  %v212_v46 = vmul.f32 %v1084_v39, %v1084_v39 }
  0x96   :  { %v57_v35 = vpop.xlane.xlu0 %56  ;;  %v1088_v42 = vmul.f32 0.00390625, %v81_v34 }
  0x97   :  { %v1082_v37 = vmul.f32 0.00390625, %v57_v35 }
  0x98   :  { %v221_v52 = vmul.f32 %v1088_v42, %v1088_v42 }
  0x99   :  { %v84_v36 = vpop.xlane.xlu1 %83  ;;  %v213_v43 = vmul.f32 %v1082_v37, %v1082_v37 }
  0x9a   :  { %v60_v38 = vpop.xlane.xlu0 %59  ;;  %v1102_v59 = vmul.f32 0.00390625, %v84_v36 }
  0x9b   :  { %v1114_v5 = vmul.f32 0.00390625, %v60_v38 }
  0x9c   :  { %v222_v2 = vmul.f32 %v1102_v59, %v1102_v59 }
  0x9d   :  { %v153_v40 = vpop.xlane.xlu1 %152  ;;  %v214_v13 = vmul.f32 %v1114_v5, %v1114_v5 }
  0x9e   :  { %v197_v44 = vmul.f32 0.00390625, %v153_v40  ;;  %v150_v45 = vpop.xlane.xlu0 %149 }
  0x9f   :  { %v196_v47 = vmul.f32 0.00390625, %v150_v45 }
  0xa0   :  { %v229_v48 = vsub.f32 %v197_v44, %v213_v43 }
  0xa1   :  { %v228_v49 = vsub.f32 %v196_v47, %v212_v46  ;;  %v177_v50 = vpop.xlane.xlu1 %176 }
  0xa2   :  { %v205_v53 = vmul.f32 0.00390625, %v177_v50  ;;  %v174_v54 = vpop.xlane.xlu0 %173  ;;  %v1098_v55 = vmax.f32 %v229_v48, 0.0 }
  0xa3   :  { %v204_v56 = vmul.f32 0.00390625, %v174_v54  ;;  %v1100_v57 = vmax.f32 %v228_v49, 0.0 }
  0xa4   :  { %v237_v60 = vsub.f32 %v205_v53, %v221_v52  ;;  %827 = vrsqrt.f32 %v1098_v55  ;;  %vm269_vm0 = vcmp.eq.f32.partialorder %v1098_v55, inf  ;;  %vm271_vm1 = vcmp.eq.f32.partialorder %v1098_v55, 0.0 }
  0xa5   :  { %v87_v58 = vpop.xlane.xlu1 %86  ;;  %v236_v61 = vsub.f32 %v204_v56, %v220_v51  ;;  %829 = vrsqrt.f32 %v1100_v57  ;;  %v272_v36 = vand.u32 2147483648, %v1098_v55  ;;  %vm262_vm2 = vcmp.eq.f32.partialorder %v1100_v57, inf }
  0xa6   :  { %v63_v62 = vpop.xlane.xlu0 %62  ;;  %v1105_v63 = vmax.f32 %v237_v60, 0.0  ;;  %v1116_v9 = vmul.f32 0.00390625, %v87_v58  ;;  %v265_v43 = vand.u32 2147483648, %v1100_v57  ;;  %vm264_vm6 = vcmp.eq.f32.partialorder %v1100_v57, 0.0 }
  0xa7   :  { %v1107_v0 = vmax.f32 %v236_v61, 0.0  ;;  %v1122_v15 = vmul.f32 0.00390625, %v63_v62 }
  0xa8   :  { %831 = vrsqrt.f32 %v1105_v63  ;;  %v223_v18 = vmul.f32 %v1116_v9, %v1116_v9  ;;  %vm325_vm3 = vcmp.eq.f32.partialorder %v1105_v63, inf  ;;  %vm327_vm4 = vcmp.eq.f32.partialorder %v1105_v63, 0.0 }
  0xa9   :  { %v180_v1 = vpop.xlane.xlu1 %179  ;;  %833 = vrsqrt.f32 %v1107_v0  ;;  %v215_v25 = vmul.f32 %v1122_v15, %v1122_v15  ;;  %v328_v44 = vand.u32 2147483648, %v1105_v63  ;;  %vm318_vm5 = vcmp.eq.f32.partialorder %v1107_v0, inf }
  0xaa   :  { %v156_v3 = vpop.xlane.xlu0 %155  ;;  %v206_v4 = vmul.f32 0.00390625, %v180_v1  ;;  %vm320_vm7 = vcmp.eq.f32.partialorder %v1107_v0, 0.0  ;;  %v321_v53 = vand.u32 2147483648, %v1107_v0 }
  0xab   :  { %v198_v10 = vmul.f32 0.00390625, %v156_v3 }
  0xac   :  { %v238_v7 = vsub.f32 %v206_v4, %v222_v2 }
  0xad   :  { %v90_v6 = vpop.xlane.xlu1 %89  ;;  %v230_v19 = vsub.f32 %v198_v10, %v214_v13 }
  0xae   :  { %v66_v8 = vpop.xlane.xlu0 %65  ;;  %v1118_v11 = vmax.f32 %v238_v7, 0.0  ;;  %v828_v12 = vpop.eup %827  ;;  %v1135_v30 = vmul.f32 0.00390625, %v90_v6 }
  0xaf   :  { %v830_v17 = vpop.eup %829  ;;  %v268_v21 = vmul.f32 %v828_v12, %v1098_v55  ;;  %v1133_v29 = vmax.f32 %v230_v19, 0.0  ;;  %v1148_v45 = vmul.f32 0.00390625, %v66_v8 }
  0xb0   :  { %835 = vrsqrt.f32 %v1118_v11  ;;  %v261_v28 = vmul.f32 %v830_v17, %v1100_v57  ;;  %v224_v49 = vmul.f32 %v1135_v30, %v1135_v30  ;;  %vm332_vm8 = vcmp.eq.f32.partialorder %v1118_v11, inf }
  0xb1   :  { %v183_v14 = vpop.xlane.xlu1 %182  ;;  %v270_v32 = vsel %vm269_vm0, %v1098_v55, %v268_v21  ;;  %837 = vrsqrt.f32 %v1133_v29  ;;  %v216_v58 = vmul.f32 %v1148_v45, %v1148_v45  ;;  %vm334_vm10 = vcmp.eq.f32.partialorder %v1118_v11, 0.0 }
  0xb2   :  { %v159_v16 = vpop.xlane.xlu0 %158  ;;  %v832_v20 = vpop.eup %831  ;;  %v207_v23 = vmul.f32 0.00390625, %v183_v14  ;;  %v273_v47 = vsel %vm271_vm1, %v272_v36, %v270_v32  ;;  %v263_v48 = vsel %vm262_vm2, %v1100_v57, %v261_v28  ;;  %vm276_vm11 = vcmp.eq.f32.partialorder %v1133_v29, inf }
  0xb3   :  { %v834_v22 = vpop.eup %833  ;;  %v199_v26 = vmul.f32 0.00390625, %v159_v16  ;;  %v324_v33 = vmul.f32 %v832_v20, %v1105_v63  ;;  %v266_v56 = vsel %vm264_vm6, %v265_v43, %v263_v48  ;;  %v373_v1 = vadd.f32 %v273_v47, %v1082_v37 }
  0xb4   :  { %v239_v31 = vsub.f32 %v207_v23, %v223_v18  ;;  %v317_v34 = vmul.f32 %v834_v22, %v1107_v0  ;;  %v372_v7 = vadd.f32 %v266_v56, %v1084_v39  ;;  %v388_v39 = vld [vmem:[%s1630_s1] sm:$0xff]  ;;  %v279_v21 = vand.u32 2147483648, %v1133_v29 }
  0xb5   :  { %v93_v24 = vpop.xlane.xlu1 %92  ;;  %v231_v35 = vsub.f32 %v199_v26, %v215_v25  ;;  %v326_v50 = vsel %vm325_vm3, %v1105_v63, %v324_v33  ;;  %vm278_vm12 = vcmp.eq.f32.partialorder %v1133_v29, 0.0 }
  0xb6   :  { %v69_v27 = vpop.xlane.xlu0 %68  ;;  %v1143_v38 = vmax.f32 %v239_v31, 0.0  ;;  %v319_v51 = vsel %vm318_vm5, %v1107_v0, %v317_v34  ;;  %v329_v57 = vsel %vm327_vm4, %v328_v44, %v326_v50  ;;  %v1170_v3 = vmul.f32 0.00390625, %v93_v24  ;;  %v389_v0 = vld [vmem:[%s1630_s1 + $0x8] sm:$0xff] }
  0xb7   :  { %v1159_v52 = vmax.f32 %v231_v35, 0.0  ;;  %v322_v2 = vsel %vm320_vm7, %v321_v53, %v319_v51  ;;  %v1179_v37 = vmul.f32 0.00390625, %v69_v27  ;;  %v381_v10 = vadd.f32 %v329_v57, %v1088_v42 }
  0xb8   :  { %839 = vrsqrt.f32 %v1143_v38  ;;  %v380_v12 = vadd.f32 %v322_v2, %v1086_v41  ;;  %v397_v17 = vmul.f32 %v389_v0, %v373_v1  ;;  %v225_v18 = vmul.f32 %v1170_v3, %v1170_v3 }
  0xb9   :  { %v186_v40 = vpop.xlane.xlu1 %185  ;;  %841 = vrsqrt.f32 %v1159_v52  ;;  %v335_v41 = vand.u32 2147483648, %v1118_v11  ;;  %v217_v22 = vmul.f32 %v1179_v37, %v1179_v37  ;;  %v1202_v25 = vmul.f32 %v388_v39, %v372_v7 }
  0xba   :  { %v162_v46 = vpop.xlane.xlu0 %161  ;;  %v836_v55 = vpop.eup %835  ;;  %v208_v60 = vmul.f32 0.00390625, %v186_v40  ;;  %v405_v26 = vmul.f32 %v389_v0, %v381_v10  ;;  %v404_v27 = vmul.f32 %v388_v39, %v380_v12  ;;  %v1206_v32 = vsel %vm412_vm9, %v397_v17, 0.0 }
  0xbb   :  { %v200_v61 = vmul.f32 0.00390625, %v162_v46  ;;  %v331_v8 = vmul.f32 %v836_v55, %v1118_v11  ;;  %v838_v24 = vpop.eup %837  ;;  %vm339_vm13 = vcmp.eq.f32.partialorder %v1143_v38, inf  ;;  %vm341_vm14 = vcmp.eq.f32.partialorder %v1143_v38, 0.0 }
  0xbc   :  { %v240_v4 = vsub.f32 %v208_v60, %v224_v49  ;;  %v275_v43 = vmul.f32 %v838_v24, %v1133_v29  ;;  %v342_v44 = vand.u32 2147483648, %v1143_v38  ;;  %v435_v50 = vsel %vm412_vm9, %v405_v26, 0.0 }
  0xbd   :  { %v96_v54 = vpop.xlane.xlu1 %95  ;;  %v232_v6 = vsub.f32 %v200_v61, %v216_v58  ;;  %v333_v42 = vsel %vm332_vm8, %v1118_v11, %v331_v8  ;;  %v434_v11 = vsel %vm412_vm9, %v404_v27, 0.0  ;;  %vm283_vm15 = vcmp.eq.f32.partialorder %v1159_v52, inf  ;;  %v390_v58 = vld [vmem:[%s1630_s1 + $0x10] sm:$0xff] }
  0xbe   :  { %v72_v62 = vpop.xlane.xlu0 %71  ;;  %v1183_v13 = vmax.f32 %v240_v4, 0.0  ;;  %v1209_v33 = vmul.f32 0.00390625, %v96_v54  ;;  %v336_v36 = vsel %vm334_vm10, %v335_v41, %v333_v42  ;;  %vm285_vm0 = vcmp.eq.f32.partialorder %v1159_v52, 0.0 }
  0xbf   :  { %v1185_v14 = vmax.f32 %v232_v6, 0.0  ;;  %v1226_v53 = vmul.f32 0.00390625, %v72_v62  ;;  %v382_v54 = vadd.f32 %v336_v36, %v1102_v59  ;;  %v286_v60 = vand.u32 2147483648, %v1159_v52  ;;  %v391_v36 = vld [vmem:[%s1630_s1 + $0x18] sm:$0xff] }
  0xc0   :  { %843 = vrsqrt.f32 %v1183_v13  ;;  %v226_v55 = vmul.f32 %v1209_v33, %v1209_v33  ;;  %v436_v61 = vadd.f32 %v435_v50, %v434_v11  ;;  %v277_v62 = vsel %vm276_vm11, %v1133_v29, %v275_v43 }
  0xc1   :  { %v189_v63 = vpop.xlane.xlu1 %188  ;;  %845 = vrsqrt.f32 %v1185_v14  ;;  %v218_v6 = vmul.f32 %v1226_v53, %v1226_v53  ;;  %vm346_vm1 = vcmp.eq.f32.partialorder %v1183_v13, inf  ;;  %v280_v17 = vsel %vm278_vm12, %v279_v21, %v277_v62 }
  0xc2   :  { %v165_v16 = vpop.xlane.xlu0 %164  ;;  %v209_v19 = vmul.f32 0.00390625, %v189_v63  ;;  %v840_v31 = vpop.eup %839  ;;  %v406_v63 = vmul.f32 %v390_v58, %v382_v54  ;;  %vm348_vm2 = vcmp.eq.f32.partialorder %v1183_v13, 0.0  ;;  %v349_v41 = vand.u32 2147483648, %v1183_v13 }
  0xc3   :  { %v201_v20 = vmul.f32 0.00390625, %v165_v16  ;;  %v842_v49 = vpop.eup %841  ;;  %v338_v51 = vmul.f32 %v840_v31, %v1143_v38  ;;  %v374_v26 = vadd.f32 %v280_v17, %v1114_v5  ;;  %vm290_vm3 = vcmp.eq.f32.partialorder %v1185_v14, inf }
  0xc4   :  { %v241_v34 = vsub.f32 %v209_v19, %v225_v18  ;;  %v282_v1 = vmul.f32 %v842_v49, %v1159_v52  ;;  %v293_v49 = vand.u32 2147483648, %v1185_v14  ;;  %vm292_vm6 = vcmp.eq.f32.partialorder %v1185_v14, 0.0 }
  0xc5   :  { %v99_v23 = vpop.xlane.xlu1 %98  ;;  %v233_v35 = vsub.f32 %v201_v20, %v217_v22  ;;  %v340_v4 = vsel %vm339_vm13, %v1143_v38, %v338_v51  ;;  %v437_v38 = vsel %vm412_vm9, %v406_v63, 0.0 }
  0xc6   :  { %v75_v28 = vpop.xlane.xlu0 %74  ;;  %v1215_v40 = vmul.f32 0.00390625, %v99_v23  ;;  %v1219_v46 = vmax.f32 %v241_v34, 0.0  ;;  %v343_v19 = vsel %vm341_vm14, %v342_v44, %v340_v4  ;;  %v284_v20 = vsel %vm283_vm15, %v1159_v52, %v282_v1 }
  0xc7   :  { %v1221_v47 = vmax.f32 %v233_v35, 0.0  ;;  %v1264_v29 = vmul.f32 0.00390625, %v75_v28  ;;  %v383_v31 = vadd.f32 %v343_v19, %v1116_v9  ;;  %v287_v34 = vsel %vm285_vm0, %v286_v60, %v284_v20 }
  0xc8   :  { %847 = vrsqrt.f32 %v1219_v46  ;;  %v227_v59 = vmul.f32 %v1215_v40, %v1215_v40  ;;  %vm353_vm4 = vcmp.eq.f32.partialorder %v1219_v46, inf  ;;  %v356_v9 = vand.u32 2147483648, %v1219_v46 }
  0xc9   :  { %v192_v48 = vpop.xlane.xlu1 %191  ;;  %849 = vrsqrt.f32 %v1221_v47  ;;  %vm355_vm5 = vcmp.eq.f32.partialorder %v1219_v46, 0.0  ;;  %v219_v44 = vmul.f32 %v1264_v29, %v1264_v29  ;;  %v407_v11 = vmul.f32 %v391_v36, %v383_v31 }
  0xca   :  { %v168_v56 = vpop.xlane.xlu0 %167  ;;  %v210_v57 = vmul.f32 0.00390625, %v192_v48  ;;  %v844_v0 = vpop.eup %843  ;;  %v375_v48 = vadd.f32 %v287_v34, %v1122_v15  ;;  %v398_v60 = vmul.f32 %v390_v58, %v374_v26  ;;  %v392_v15 = vld [vmem:[%s1630_s1 + $0x20] sm:$0xff]  ;;  %v438_v62 = vadd.f32 %v437_v38, %v436_v61 }
  0xcb   :  { %v202_v7 = vmul.f32 0.00390625, %v168_v56  ;;  %v345_v10 = vmul.f32 %v844_v0, %v1183_v13  ;;  %v846_v16 = vpop.eup %845  ;;  %v413_v56 = vsel %vm412_vm9, %v1202_v25, 0.0  ;;  %vm297_vm7 = vcmp.eq.f32.partialorder %v1221_v47, inf }
  0xcc   :  { %v242_v12 = vsub.f32 %v210_v57, %v226_v55  ;;  %v289_v27 = vmul.f32 %v846_v16, %v1185_v14  ;;  %vm299_vm8 = vcmp.eq.f32.partialorder %v1221_v47, 0.0  ;;  %v439_v25 = vsel %vm412_vm9, %v407_v11, 0.0 }
  0xcd   :  { %v195_v2 = vpop.xlane.xlu1 %194  ;;  %v234_v39 = vsub.f32 %v202_v7, %v218_v6  ;;  %v347_v23 = vsel %vm346_vm1, %v1183_v13, %v345_v10  ;;  %v300_v61 = vand.u32 2147483648, %v1221_v47  ;;  %v415_v34 = vadd.f32 %v1206_v32, %v413_v56 }
  0xce   :  { %v211_v8 = vmul.f32 0.00390625, %v195_v2  ;;  %v1261_v42 = vmax.f32 %v242_v12, 0.0  ;;  %v171_v22 = vpop.xlane.xlu0 %170  ;;  %v350_v5 = vsel %vm348_vm2, %v349_v41, %v347_v23  ;;  %v291_v13 = vsel %vm290_vm3, %v1185_v14, %v289_v27  ;;  %v393_v14 = vld [vmem:[%s1630_s1 + $0x28] sm:$0xff] }
  0xcf   :  { %v1266_v21 = vmax.f32 %v234_v39, 0.0  ;;  %v203_v28 = vmul.f32 0.00390625, %v171_v22  ;;  %v384_v51 = vadd.f32 %v350_v5, %v1135_v30  ;;  %v294_v1 = vsel %vm292_vm6, %v293_v49, %v291_v13 }
  0xd0   :  { %v243_v18 = vsub.f32 %v211_v8, %v227_v59  ;;  %851 = vrsqrt.f32 %v1261_v42  ;;  %v399_v30 = vmul.f32 %v391_v36, %v375_v48  ;;  %v376_v4 = vadd.f32 %v294_v1, %v1148_v45 }
  0xd1   :  { %853 = vrsqrt.f32 %v1266_v21  ;;  %v235_v55 = vsub.f32 %v203_v28, %v219_v44  ;;  %v408_v58 = vmul.f32 %v392_v15, %v384_v51  ;;  %vm360_vm10 = vcmp.eq.f32.partialorder %v1261_v42, inf }
  0xd2   :  { %v1268_v24 = vmax.f32 %v243_v18, 0.0  ;;  %v848_v35 = vpop.eup %847  ;;  %vm362_vm11 = vcmp.eq.f32.partialorder %v1261_v42, 0.0  ;;  %vm304_vm12 = vcmp.eq.f32.partialorder %v1266_v21, inf  ;;  %vm306_vm13 = vcmp.eq.f32.partialorder %v1266_v21, 0.0  ;;  %v394_v18 = vld [vmem:[%s1630_s1 + $0x30] sm:$0xff] }
  0xd3   :  { %v850_v43 = vpop.eup %849  ;;  %v352_v52 = vmul.f32 %v848_v35, %v1219_v46  ;;  %v1304_v57 = vmax.f32 %v235_v55, 0.0  ;;  %v307_v10 = vand.u32 2147483648, %v1266_v21  ;;  %v441_v12 = vsel %vm412_vm9, %v408_v58, 0.0 }
  0xd4   :  { %855 = vrsqrt.f32 %v1268_v24  ;;  %v296_v50 = vmul.f32 %v850_v43, %v1221_v47  ;;  %vm367_vm14 = vcmp.eq.f32.partialorder %v1268_v24, inf  ;;  %vm369_vm15 = vcmp.eq.f32.partialorder %v1268_v24, 0.0 }
  0xd5   :  { %v354_v54 = vsel %vm353_vm4, %v1219_v46, %v352_v52  ;;  %857 = vrsqrt.f32 %v1304_v57  ;;  %v370_v17 = vand.u32 2147483648, %v1268_v24  ;;  %v416_v22 = vsel %vm412_vm9, %v398_v60, 0.0 }
  0xd6   :  { %v357_v59 = vsel %vm355_vm5, %v356_v9, %v354_v54  ;;  %v298_v2 = vsel %vm297_vm7, %v1221_v47, %v296_v50  ;;  %v440_v23 = vadd.f32 %v439_v25, %v438_v62  ;;  %v418_v36 = vsel %vm412_vm9, %v399_v30, 0.0 }
  0xd7   :  { %v385_v46 = vadd.f32 %v357_v59, %v1170_v3  ;;  %v363_v3 = vand.u32 2147483648, %v1261_v42  ;;  %v301_v7 = vsel %vm299_vm8, %v300_v61, %v298_v2  ;;  %v417_v43 = vadd.f32 %v416_v22, %v415_v34 }
  0xd8   :  { %v377_v39 = vadd.f32 %v301_v7, %v1179_v37  ;;  %v400_v37 = vmul.f32 %v392_v15, %v376_v4  ;;  %v442_v28 = vadd.f32 %v441_v12, %v440_v23  ;;  %vm311_vm0 = vcmp.eq.f32.partialorder %v1304_v57, inf }
  0xd9   :  { %v409_v47 = vmul.f32 %v393_v14, %v385_v46  ;;  %v419_v50 = vadd.f32 %v418_v36, %v417_v43  ;;  %vm313_vm1 = vcmp.eq.f32.partialorder %v1304_v57, 0.0  ;;  %v467_v36 = vld [vmem:[%s1632_s3 + $0x38] sm:$0xff] }
  0xda   :  { %v852_v0 = vpop.eup %851  ;;  %v401_v5 = vmul.f32 %v393_v14, %v377_v39  ;;  %v420_v32 = vsel %vm412_vm9, %v400_v37, 0.0  ;;  %v460_v39 = vld [vmem:[%s1632_s3] sm:$0xff] }
  0xdb   :  { %v854_v6 = vpop.eup %853  ;;  %v359_v8 = vmul.f32 %v852_v0, %v1261_v42  ;;  %v443_v27 = vsel %vm412_vm9, %v409_v47, 0.0  ;;  %v421_v55 = vadd.f32 %v420_v32, %v419_v50 }
  0xdc   :  { %v303_v63 = vmul.f32 %v854_v6, %v1266_v21  ;;  %v444_v52 = vadd.f32 %v443_v27, %v442_v28  ;;  %v422_v51 = vsel %vm412_vm9, %v401_v5, 0.0  ;;  %v466_v5 = vld [vmem:[%s1632_s3 + $0x30] sm:$0xff] }
  0xdd   :  { %v361_v16 = vsel %vm360_vm10, %v1261_v42, %v359_v8  ;;  %v423_v62 = vadd.f32 %v422_v51, %v421_v55 }
  0xde   :  { %v856_v45 = vpop.eup %855  ;;  %v364_v19 = vsel %vm362_vm11, %v363_v3, %v361_v16  ;;  %v305_v20 = vsel %vm304_vm12, %v1266_v21, %v303_v63 }
  0xdf   :  { %v366_v41 = vmul.f32 %v856_v45, %v1268_v24  ;;  %v386_v38 = vadd.f32 %v364_v19, %v1209_v33  ;;  %v308_v26 = vsel %vm306_vm13, %v307_v10, %v305_v20  ;;  %v395_v33 = vld [vmem:[%s1630_s1 + $0x38] sm:$0xff]  ;;  %v858_v9 = vpop.eup %857  ;;  %v462_v20 = vld [vmem:[%s1632_s3 + $0x10] sm:$0xff] }
  0xe0   :  { %v378_v31 = vadd.f32 %v308_v26, %v1226_v53  ;;  %v310_v49 = vmul.f32 %v858_v9, %v1304_v57  ;;  %v463_v19 = vld [vmem:[%s1632_s3 + $0x18] sm:$0xff] }
  0xe1   :  { %v368_v42 = vsel %vm367_vm14, %v1268_v24, %v366_v41  ;;  %v410_v35 = vmul.f32 %v394_v18, %v386_v38  ;;  %v314_v24 = vand.u32 2147483648, %v1304_v57 }
  0xe2   :  { %v371_v21 = vsel %vm369_vm15, %v370_v17, %v368_v42  ;;  %v402_v48 = vmul.f32 %v394_v18, %v378_v31  ;;  %v312_v54 = vsel %vm311_vm0, %v1304_v57, %v310_v49  ;;  %v468_v57 = vlaneseq  ;;  %v461_v17 = vld [vmem:[%s1632_s3 + $0x8] sm:$0xff]  ;;  %v464_v42 = vld [vmem:[%s1632_s3 + $0x20] sm:$0xff] }
  0xe3   :  { %v387_v53 = vadd.f32 %v371_v21, %v1215_v40  ;;  %v445_v44 = vsel %vm412_vm9, %v410_v35, 0.0  ;;  %v315_v60 = vsel %vm313_vm1, %v314_v24, %v312_v54  ;;  %v465_v31 = vld [vmem:[%s1632_s3 + $0x28] sm:$0xff] }
  0xe4   :  { %v446_v11 = vadd.f32 %v445_v44, %v444_v52  ;;  %v424_v15 = vsel %vm412_vm9, %v402_v48, 0.0  ;;  %v379_v59 = vadd.f32 %v315_v60, %v1264_v29  ;;  %v469_v8 = vshrl.u32 %v468_v57, 7  ;;  %v455_v29 = vld [vmem:[%s1631_s2] sm:$0x1]  ;;  %v542_v57 = vld [vmem:[%s1633_s4 + $0x10] sm:$0xff] }
  0xe5   :  { %v411_v13 = vmul.f32 %v395_v33, %v387_v53  ;;  %v425_v46 = vadd.f32 %v424_v15, %v423_v62 }
  0xe6   :  { %v403_v30 = vmul.f32 %v395_v33, %v379_v59  ;;  %v470_v45 = vsub.s32 0, %v469_v8 }
  0xe7   :  { %v447_v40 = vsel %vm412_vm9, %v411_v13, 0.0 }
  0xe8   :  { %v448_v56 = vadd.f32 %v447_v40, %v446_v11  ;;  %v426_v2 = vsel %vm412_vm9, %v403_v30, 0.0 }
  0xe9   :  { %v427_v25 = vadd.f32 %v426_v2, %v425_v46  ;;  %v955_v46 = vmov 0   ;;  %v541_v2 = vld [vmem:[%s1633_s4 + $0x8] sm:$0xff] }
  0xea   :  { %v449_v1 = vrot.slane %v448_v56, 4  ;;  %826 = vset.pattern.permute.xlu1 %v955_v46  ;;  %825 = vset.pattern.permute.xlu0 %v955_v46 }
  0xeb   :  { %v428_v14 = vrot.slane %v427_v25, 4 }
  0xec   :  { %v450_v58 = vadd.f32 %v449_v1, %v448_v56 }
  0xed   :  { %v429_v61 = vadd.f32 %v428_v14, %v427_v25  ;;  %v540_v25 = vld [vmem:[%s1633_s4] sm:$0xff] }
  0xee   :  { %v451_v0 = vrot.slane %v450_v58, 2 }
  0xef   :  { %v430_v4 = vrot.slane %v429_v61, 2 }
  0xf0   :  { %v452_v6 = vadd.f32 %v451_v0, %v450_v58 }
  0xf1   :  { %v431_v3 = vadd.f32 %v430_v4, %v429_v61  ;;  %v543_v4 = vld [vmem:[%s1633_s4 + $0x18] sm:$0xff] }
  0xf2   :  { %v453_v63 = vrot.slane %v452_v6, 1 }
  0xf3   :  { %v432_v7 = vrot.slane %v431_v3, 1 }
  0xf4   :  { %v454_v16 = vadd.f32 %v453_v63, %v452_v6  ;;  %v545_v63 = vld [vmem:[%s1633_s4 + $0x28] sm:$0xff] }
  0xf5   :  { %v433_v47 = vadd.f32 %v432_v7, %v431_v3 }
  0xf6   :  { %v457_v23 = vadd.f32 %v455_v29, %v454_v16 }
  0xf7   :  { %v456_v10 = vadd.f32 %v455_v29, %v433_v47 }
  0xf8   :  { %v459_v34 = vmax.f32 %v457_v23, 0.0 }
  0xf9   :  { %v458_v12 = vmax.f32 %v456_v10, 0.0  ;;  %v544_v10 = vld [vmem:[%s1633_s4 + $0x20] sm:$0xff] }
  0xfa   :  { %v475_v53 = vrot.slane %v459_v34, %v470_v45 }
  0xfb   :  { %v471_v18 = vrot.slane %v458_v12, %v470_v45 }
  0xfc   :  { %v485_v13 = vmul.f32 %v475_v53, %v461_v17  ;;  %v484_v49 = vmul.f32 %v475_v53, %v460_v39  ;;  %v487_v24 = vmul.f32 %v475_v53, %v463_v19  ;;  %v486_v51 = vmul.f32 %v475_v53, %v462_v20 }
  0xfd   :  { %v477_v41 = vmul.f32 %v471_v18, %v461_v17  ;;  %v476_v22 = vmul.f32 %v471_v18, %v460_v39  ;;  %v479_v37 = vmul.f32 %v471_v18, %v463_v19  ;;  %v478_v27 = vmul.f32 %v471_v18, %v462_v20 }
  0xfe   :  { %v481_v33 = vmul.f32 %v471_v18, %v465_v31  ;;  %v480_v21 = vmul.f32 %v471_v18, %v464_v42  ;;  %v483_v52 = vmul.f32 %v471_v18, %v467_v36  ;;  %v482_v44 = vmul.f32 %v471_v18, %v466_v5 }
  0xff   :  { %v495_v38 = vsel %vm412_vm9, %v477_v41, 0.0  ;;  %v492_v26 = vsel %vm412_vm9, %v476_v22, 0.0  ;;  %v501_v28 = vsel %vm412_vm9, %v479_v37, 0.0  ;;  %v498_v35 = vsel %vm412_vm9, %v478_v27, 0.0  ;;  %v1430_v41 = vld [vmem:[%s1633_s4 + $0x30] sm:$0xff]  ;;  %v547_v37 = vld [vmem:[%s1633_s4 + $0x38] sm:$0xff] }
 0x100   :  { %496 = vadd.xlane.f32.xlu1 %v495_v38  ;;  %493 = vadd.xlane.f32.xlu0 %v492_v26  ;;  %v507_v9 = vsel %vm412_vm9, %v481_v33, 0.0  ;;  %v504_v43 = vsel %vm412_vm9, %v480_v21, 0.0  ;;  %v513_v32 = vsel %vm412_vm9, %v483_v52, 0.0  ;;  %v510_v48 = vsel %vm412_vm9, %v482_v44, 0.0 }
 0x101   :  { %v519_v50 = vsel %vm412_vm9, %v485_v13, 0.0  ;;  %v516_v11 = vsel %vm412_vm9, %v484_v49, 0.0  ;;  %v525_v40 = vsel %vm412_vm9, %v487_v24, 0.0  ;;  %v522_v54 = vsel %vm412_vm9, %v486_v51, 0.0 }
 0x102   :  { %v489_v55 = vmul.f32 %v475_v53, %v465_v31  ;;  %v488_v56 = vmul.f32 %v475_v53, %v464_v42  ;;  %v491_v59 = vmul.f32 %v475_v53, %v467_v36  ;;  %v490_v62 = vmul.f32 %v475_v53, %v466_v5 }
 0x104   :  { %502 = vadd.xlane.f32.xlu1 %v501_v28  ;;  %499 = vadd.xlane.f32.xlu0 %v498_v35  ;;  %v531_v60 = vsel %vm412_vm9, %v489_v55, 0.0  ;;  %v528_v15 = vsel %vm412_vm9, %v488_v56, 0.0  ;;  %v537_v1 = vsel %vm412_vm9, %v491_v59, 0.0  ;;  %v534_v30 = vsel %vm412_vm9, %v490_v62, 0.0 }
 0x108   :  { %508 = vadd.xlane.f32.xlu1 %v507_v9  ;;  %505 = vadd.xlane.f32.xlu0 %v504_v43 }
 0x10c   :  { %514 = vadd.xlane.f32.xlu1 %v513_v32  ;;  %511 = vadd.xlane.f32.xlu0 %v510_v48 }
 0x110   :  { %520 = vadd.xlane.f32.xlu1 %v519_v50  ;;  %517 = vadd.xlane.f32.xlu0 %v516_v11 }
 0x114   :  { %526 = vadd.xlane.f32.xlu1 %v525_v40  ;;  %523 = vadd.xlane.f32.xlu0 %v522_v54 }
 0x118   :  { %532 = vadd.xlane.f32.xlu1 %v531_v60  ;;  %529 = vadd.xlane.f32.xlu0 %v528_v15 }
 0x11c   :  { %538 = vadd.xlane.f32.xlu1 %v537_v1  ;;  %535 = vadd.xlane.f32.xlu0 %v534_v30 }
 0x18d   :  { %v497_v58 = vpop.xlane.xlu1 %496  ;;  %v494_v14 = vpop.xlane.xlu0 %493 }
 0x18e   :  { %v549_v61 = vadd.f32 %v541_v2, %v497_v58  ;;  %v548_v0 = vadd.f32 %v540_v25, %v494_v14 }
 0x190   :  { %v809_v3 = vmul.f32 -1.442695, %v549_v61  ;;  %v808_v6 = vmul.f32 -1.442695, %v548_v0 }
 0x191   :  { %v503_v7 = vpop.xlane.xlu1 %502  ;;  %v500_v8 = vpop.xlane.xlu0 %499 }
 0x192   :  { %859 = vpow2.f32 %v809_v3  ;;  %v551_v29 = vadd.f32 %v543_v4, %v503_v7  ;;  %v550_v47 = vadd.f32 %v542_v57, %v500_v8 }
 0x193   :  { %861 = vpow2.f32 %v808_v6 }
 0x194   :  { %v811_v45 = vmul.f32 -1.442695, %v551_v29  ;;  %v810_v12 = vmul.f32 -1.442695, %v550_v47 }
 0x195   :  { %v509_v16 = vpop.xlane.xlu1 %508  ;;  %v506_v17 = vpop.xlane.xlu0 %505 }
 0x196   :  { %863 = vpow2.f32 %v811_v45  ;;  %v553_v39 = vadd.f32 %v545_v63, %v509_v16  ;;  %v552_v18 = vadd.f32 %v544_v10, %v506_v17 }
 0x197   :  { %865 = vpow2.f32 %v810_v12 }
 0x198   :  { %v813_v19 = vmul.f32 -1.442695, %v553_v39  ;;  %v812_v20 = vmul.f32 -1.442695, %v552_v18 }
 0x199   :  { %v515_v22 = vpop.xlane.xlu1 %514  ;;  %v512_v23 = vpop.xlane.xlu0 %511 }
 0x19a   :  { %867 = vpow2.f32 %v812_v20  ;;  %v554_v38 = vadd.f32 %v1430_v41, %v512_v23  ;;  %v555_v33 = vadd.f32 %v547_v37, %v515_v22 }
 0x19b   :  { %869 = vpow2.f32 %v813_v19 }
 0x19c   :  { %v860_v26 = vpop.eup %859  ;;  %v814_v21 = vmul.f32 -1.442695, %v554_v38  ;;  %v815_v32 = vmul.f32 -1.442695, %v555_v33 }
 0x19d   :  { %v862_v27 = vpop.eup %861  ;;  %v613_v31 = vadd.f32 1.0, %v860_v26  ;;  %v521_v42 = vpop.xlane.xlu1 %520 }
 0x19e   :  { %v518_v34 = vpop.xlane.xlu0 %517  ;;  %v612_v28 = vadd.f32 1.0, %v862_v27  ;;  %v557_v35 = vadd.f32 %v541_v2, %v521_v42 }
 0x19f   :  { %871 = vrcp.f32 %v613_v31  ;;  %v556_v48 = vadd.f32 %v540_v25, %v518_v34 }
 0x1a0   :  { %v864_v36 = vpop.eup %863  ;;  %873 = vrcp.f32 %v612_v28  ;;  %v817_v5 = vmul.f32 -1.442695, %v557_v35 }
 0x1a1   :  { %v866_v53 = vpop.eup %865  ;;  %v527_v9 = vpop.xlane.xlu1 %526  ;;  %v615_v13 = vadd.f32 1.0, %v864_v36  ;;  %v816_v55 = vmul.f32 -1.442695, %v556_v48  ;;  %v925_v48 = vld [vmem:[%s1629_s0] sm:$0xff] }
 0x1a2   :  { %v524_v43 = vpop.xlane.xlu0 %523  ;;  %v614_v52 = vadd.f32 1.0, %v866_v53  ;;  %875 = vpow2.f32 %v817_v5  ;;  %v559_v44 = vadd.f32 %v543_v4, %v527_v9  ;;  %v923_v9 = vld [vmem:[%s1629_s0 + $0x10] sm:$0xff] }
 0x1a3   :  { %877 = vpow2.f32 %v814_v21  ;;  %v558_v40 = vadd.f32 %v542_v57, %v524_v43 }
 0x1a4   :  { %879 = vrcp.f32 %v614_v52  ;;  %v819_v49 = vmul.f32 -1.442695, %v559_v44  ;;  %v868_v50 = vpop.eup %867  ;;  %v924_v52 = vld [vmem:[%s1629_s0 + $0x18] sm:$0xff] }
 0x1a5   :  { %v533_v11 = vpop.xlane.xlu1 %532  ;;  %v870_v51 = vpop.eup %869  ;;  %v616_v56 = vadd.f32 1.0, %v868_v50  ;;  %v818_v30 = vmul.f32 -1.442695, %v558_v40  ;;  %v928_v40 = vld [vmem:[%s1629_s0 + $0x28] sm:$0xff] }
 0x1a6   :  { %v530_v24 = vpop.xlane.xlu0 %529  ;;  %881 = vpow2.f32 %v819_v49  ;;  %v561_v54 = vadd.f32 %v545_v63, %v533_v11  ;;  %v617_v59 = vadd.f32 1.0, %v870_v51  ;;  %v926_v49 = vld [vmem:[%s1629_s0 + $0x8] sm:$0xff] }
 0x1a7   :  { %883 = vpow2.f32 %v815_v32  ;;  %v560_v46 = vadd.f32 %v544_v10, %v530_v24  ;;  %v927_v24 = vld [vmem:[%s1629_s0 + $0x20] sm:$0xff] }
 0x1a8   :  { %885 = vrcp.f32 %v615_v13  ;;  %v821_v60 = vmul.f32 -1.442695, %v561_v54 }
 0x1a9   :  { %v872_v15 = vpop.eup %871  ;;  %v539_v62 = vpop.xlane.xlu1 %538  ;;  %v820_v57 = vmul.f32 -1.442695, %v560_v46  ;;  %v932_v46 = vld [vmem:[%s1629_s0 + $0x48] sm:$0xff] }
 0x1aa   :  { %v874_v1 = vpop.eup %873  ;;  %887 = vpow2.f32 %v821_v60  ;;  %v563_v2 = vadd.f32 %v547_v37, %v539_v62  ;;  %667 = vperm.xlu1 %826, %v872_v15   ;;  %v536_v25 = vpop.xlane.xlu0 %535  ;;  %v930_v15 = vld [vmem:[%s1629_s0 + $0x38] sm:$0xff] }
 0x1ab   :  { %889 = vpow2.f32 %v816_v55  ;;  %662 = vperm.xlu0 %825, %v874_v1   ;;  %v562_v3 = vadd.f32 %v1430_v41, %v536_v25  ;;  %v931_v1 = vld [vmem:[%s1629_s0 + $0x40] sm:$0xff] }
 0x1ac   :  { %v876_v58 = vpop.eup %875  ;;  %891 = vrcp.f32 %v616_v56  ;;  %v823_v14 = vmul.f32 -1.442695, %v563_v2  ;;  %v929_v56 = vld [vmem:[%s1629_s0 + $0x30] sm:$0xff] }
 0x1ad   :  { %v878_v61 = vpop.eup %877  ;;  %893 = vrcp.f32 %v617_v59  ;;  %v621_v0 = vadd.f32 1.0, %v876_v58  ;;  %v822_v63 = vmul.f32 -1.442695, %v562_v3 }
 0x1ae   :  { %v880_v4 = vpop.eup %879  ;;  %895 = vpow2.f32 %v818_v30  ;;  %v618_v7 = vadd.f32 1.0, %v878_v61 }
 0x1af   :  { %897 = vrcp.f32 %v621_v0  ;;  %672 = vperm.xlu1 %826, %v880_v4   ;;  %v934_v0 = vld [vmem:[%s1629_s0 + $0x98] sm:$0xff] }
 0x1b0   :  { %v882_v6 = vpop.eup %881  ;;  %899 = vpow2.f32 %v823_v14  ;;  %v933_v14 = vld [vmem:[%s1629_s0 + $0x90] sm:$0xff] }
 0x1b1   :  { %v884_v8 = vpop.eup %883  ;;  %v623_v29 = vadd.f32 1.0, %v882_v6  ;;  %901 = vpow2.f32 %v820_v57  ;;  %v935_v57 = vld [vmem:[%s1629_s0 + $0x50] sm:$0xff]  ;;  %v936_v6 = vld [vmem:[%s1629_s0 + $0x58] sm:$0xff] }
 0x1b2   :  { %v886_v47 = vpop.eup %885  ;;  %v619_v45 = vadd.f32 1.0, %v884_v8 }
 0x1b3   :  { %903 = vrcp.f32 %v623_v29  ;;  %677 = vperm.xlu1 %826, %v886_v47   ;;  %v937_v47 = vld [vmem:[%s1629_s0 + $0xb0] sm:$0xff] }
 0x1b4   :  { %v888_v10 = vpop.eup %887  ;;  %905 = vrcp.f32 %v618_v7 }
 0x1b5   :  { %v890_v12 = vpop.eup %889  ;;  %v625_v16 = vadd.f32 1.0, %v888_v10  ;;  %907 = vpow2.f32 %v822_v63  ;;  %v938_v10 = vld [vmem:[%s1629_s0 + $0xb8] sm:$0xff] }
 0x1b6   :  { %v892_v17 = vpop.eup %891  ;;  %v620_v19 = vadd.f32 1.0, %v890_v12  ;;  %v939_v12 = vld [vmem:[%s1629_s0 + $0x60] sm:$0xff] }
 0x1b7   :  { %v894_v39 = vpop.eup %893  ;;  %909 = vrcp.f32 %v625_v16  ;;  %682 = vperm.xlu1 %826, %v892_v17   ;;  %v940_v17 = vld [vmem:[%s1629_s0 + $0x68] sm:$0xff] }
 0x1b8   :  { %v896_v18 = vpop.eup %895  ;;  %911 = vrcp.f32 %v619_v45 }
 0x1b9   :  { %v898_v20 = vpop.eup %897  ;;  %913 = vrcp.f32 %v620_v19  ;;  %v622_v38 = vadd.f32 1.0, %v896_v18 }
 0x1ba   :  { %v900_v41 = vpop.eup %899  ;;  %707 = vperm.xlu0 %825, %v898_v20   ;;  %v941_v20 = vld [vmem:[%s1629_s0 + $0xd0] sm:$0xff] }
 0x1bb   :  { %v627_v22 = vadd.f32 1.0, %v900_v41  ;;  %687 = vperm.xlu1 %826, %v894_v39   ;;  %v902_v23 = vpop.eup %901 }
 0x1bc   :  { %v624_v31 = vadd.f32 1.0, %v902_v23 }
 0x1bd   :  { %v904_v26 = vpop.eup %903  ;;  %915 = vrcp.f32 %v627_v22  ;;  %v942_v22 = vld [vmem:[%s1629_s0 + $0xd8] sm:$0xff] }
 0x1be   :  { %v906_v37 = vpop.eup %905  ;;  %717 = vperm.xlu0 %825, %v904_v26   ;;  %917 = vrcp.f32 %v622_v38  ;;  %v943_v38 = vld [vmem:[%s1629_s0 + $0x70] sm:$0xff] }
 0x1bf   :  { %692 = vperm.xlu1 %826, %v906_v37   ;;  %v908_v27 = vpop.eup %907  ;;  %919 = vrcp.f32 %v624_v31  ;;  %v944_v37 = vld [vmem:[%s1629_s0 + $0x78] sm:$0xff] }
 0x1c0   :  { %v626_v28 = vadd.f32 1.0, %v908_v27 }
 0x1c1   :  { %v910_v42 = vpop.eup %909 }
 0x1c2   :  { %v912_v34 = vpop.eup %911  ;;  %727 = vperm.xlu0 %825, %v910_v42   ;;  %921 = vrcp.f32 %v626_v28  ;;  %v945_v42 = vld [vmem:[%s1629_s0 + $0x80] sm:$0xff]  ;;  %v946_v28 = vld [vmem:[%s1629_s0 + $0x88] sm:$0xff] }
 0x1c3   :  { %697 = vperm.xlu1 %826, %v912_v34   ;;  %v914_v35 = vpop.eup %913 }
 0x1c7   :  { %v916_v33 = vpop.eup %915  ;;  %702 = vperm.xlu1 %826, %v914_v35  }
 0x1c8   :  { %737 = vperm.xlu0 %825, %v916_v33   ;;  %v918_v21 = vpop.eup %917 }
 0x1c9   :  { %v920_v36 = vpop.eup %919 }
 0x1cb   :  { %712 = vperm.xlu1 %826, %v918_v21   ;;  %v947_v21 = vld [vmem:[%s1629_s0 + $0xf0] sm:$0xff] }
 0x1cc   :  { %v922_v5 = vpop.eup %921 }
 0x1cf   :  { %722 = vperm.xlu1 %826, %v920_v36  }
 0x1d3   :  { %732 = vperm.xlu1 %826, %v922_v5   ;;  %v948_v5 = vld [vmem:[%s1629_s0 + $0xf8] sm:$0xff] }
 0x229   :  { %v668_v53 = vpop.permute.xlu1 %667 }
 0x22a   :  { %v742_v43 = vmul.f32 %v923_v9, %v668_v53  ;;  %v743_v44 = vmul.f32 %v924_v52, %v668_v53  ;;  %v663_v32 = vpop.permute.xlu0 %662 }
 0x22b   :  { %v740_v13 = vmul.f32 %v925_v48, %v663_v32  ;;  %v741_v50 = vmul.f32 %v926_v49, %v663_v32 }
 0x22c   :  { %774 = vst [vmem:[%s1634_s5 + $0x10] sm:$0xff] %v742_v43  ;;  %775 = vst [vmem:[%s1634_s5 + $0x18] sm:$0xff] %v743_v44  ;;  %v949_v43 = vld [vmem:[%s1629_s0 + $0xa0] sm:$0xff]  ;;  %v950_v44 = vld [vmem:[%s1629_s0 + $0xa8] sm:$0xff] }
 0x22d   :  { %772 = vst [vmem:[%s1634_s5] sm:$0xff] %v740_v13  ;;  %773 = vst [vmem:[%s1634_s5 + $0x8] sm:$0xff] %v741_v50  ;;  %v951_v13 = vld [vmem:[%s1629_s0 + $0xc0] sm:$0xff]  ;;  %v952_v50 = vld [vmem:[%s1629_s0 + $0xc8] sm:$0xff] }
 0x22e   :  { %v673_v11 = vpop.permute.xlu1 %672 }
 0x22f   :  { %v744_v51 = vmul.f32 %v927_v24, %v673_v11  ;;  %v745_v54 = vmul.f32 %v928_v40, %v673_v11 }
 0x231   :  { %776 = vst [vmem:[%s1634_s5 + $0x20] sm:$0xff] %v744_v51  ;;  %777 = vst [vmem:[%s1634_s5 + $0x28] sm:$0xff] %v745_v54  ;;  %v953_v51 = vld [vmem:[%s1629_s0 + $0xe0] sm:$0xff]  ;;  %v954_v54 = vld [vmem:[%s1629_s0 + $0xe8] sm:$0xff] }
 0x232   :  { %v678_v55 = vpop.permute.xlu1 %677 }
 0x233   :  { %v746_v60 = vmul.f32 %v929_v56, %v678_v55  ;;  %v747_v59 = vmul.f32 %v930_v15, %v678_v55 }
 0x235   :  { %778 = vst [vmem:[%s1634_s5 + $0x30] sm:$0xff] %v746_v60  ;;  %779 = vst [vmem:[%s1634_s5 + $0x38] sm:$0xff] %v747_v59 }
 0x236   :  { %v683_v62 = vpop.permute.xlu1 %682 }
 0x237   :  { %v748_v30 = vmul.f32 %v931_v1, %v683_v62  ;;  %v749_v2 = vmul.f32 %v932_v46, %v683_v62 }
 0x239   :  { %780 = vst [vmem:[%s1634_s5 + $0x40] sm:$0xff] %v748_v30  ;;  %781 = vst [vmem:[%s1634_s5 + $0x48] sm:$0xff] %v749_v2  ;;  %v708_v25 = vpop.permute.xlu0 %707 }
 0x23a   :  { %v688_v58 = vpop.permute.xlu1 %687  ;;  %v758_v61 = vmul.f32 %v933_v14, %v708_v25  ;;  %v759_v4 = vmul.f32 %v934_v0, %v708_v25 }
 0x23b   :  { %v750_v3 = vmul.f32 %v935_v57, %v688_v58  ;;  %v751_v7 = vmul.f32 %v936_v6, %v688_v58 }
 0x23c   :  { %790 = vst [vmem:[%s1634_s5 + $0x90] sm:$0xff] %v758_v61  ;;  %791 = vst [vmem:[%s1634_s5 + $0x98] sm:$0xff] %v759_v4 }
 0x23d   :  { %782 = vst [vmem:[%s1634_s5 + $0x50] sm:$0xff] %v750_v3  ;;  %783 = vst [vmem:[%s1634_s5 + $0x58] sm:$0xff] %v751_v7  ;;  %v718_v8 = vpop.permute.xlu0 %717 }
 0x23e   :  { %v693_v29 = vpop.permute.xlu1 %692  ;;  %v762_v63 = vmul.f32 %v937_v47, %v718_v8  ;;  %v763_v45 = vmul.f32 %v938_v10, %v718_v8 }
 0x23f   :  { %v752_v16 = vmul.f32 %v939_v12, %v693_v29  ;;  %v753_v39 = vmul.f32 %v940_v17, %v693_v29 }
 0x240   :  { %794 = vst [vmem:[%s1634_s5 + $0xb0] sm:$0xff] %v762_v63  ;;  %795 = vst [vmem:[%s1634_s5 + $0xb8] sm:$0xff] %v763_v45 }
 0x241   :  { %784 = vst [vmem:[%s1634_s5 + $0x60] sm:$0xff] %v752_v16  ;;  %785 = vst [vmem:[%s1634_s5 + $0x68] sm:$0xff] %v753_v39  ;;  %v728_v18 = vpop.permute.xlu0 %727 }
 0x242   :  { %v698_v19 = vpop.permute.xlu1 %697  ;;  %v766_v41 = vmul.f32 %v941_v20, %v728_v18  ;;  %v767_v23 = vmul.f32 %v942_v22, %v728_v18 }
 0x243   :  { %v754_v26 = vmul.f32 %v943_v38, %v698_v19  ;;  %v755_v27 = vmul.f32 %v944_v37, %v698_v19 }
 0x244   :  { %798 = vst [vmem:[%s1634_s5 + $0xd0] sm:$0xff] %v766_v41  ;;  %799 = vst [vmem:[%s1634_s5 + $0xd8] sm:$0xff] %v767_v23 }
 0x245   :  { %786 = vst [vmem:[%s1634_s5 + $0x70] sm:$0xff] %v754_v26  ;;  %787 = vst [vmem:[%s1634_s5 + $0x78] sm:$0xff] %v755_v27 }
 0x246   :  { %v703_v31 = vpop.permute.xlu1 %702 }
 0x247   :  { %v756_v34 = vmul.f32 %v945_v42, %v703_v31  ;;  %v757_v35 = vmul.f32 %v946_v28, %v703_v31  ;;  %v738_v33 = vpop.permute.xlu0 %737 }
 0x248   :  { %v770_v36 = vmul.f32 %v947_v21, %v738_v33  ;;  %v771_v53 = vmul.f32 %v948_v5, %v738_v33 }
 0x249   :  { %788 = vst [vmem:[%s1634_s5 + $0x80] sm:$0xff] %v756_v34  ;;  %789 = vst [vmem:[%s1634_s5 + $0x88] sm:$0xff] %v757_v35 }
 0x24a   :  { %802 = vst [vmem:[%s1634_s5 + $0xf0] sm:$0xff] %v770_v36  ;;  %803 = vst [vmem:[%s1634_s5 + $0xf8] sm:$0xff] %v771_v53  ;;  %v713_v9 = vpop.permute.xlu1 %712 }
 0x24b   :  { %v760_v52 = vmul.f32 %v949_v43, %v713_v9  ;;  %v761_v32 = vmul.f32 %v950_v44, %v713_v9 }
 0x24d   :  { %792 = vst [vmem:[%s1634_s5 + $0xa0] sm:$0xff] %v760_v52  ;;  %793 = vst [vmem:[%s1634_s5 + $0xa8] sm:$0xff] %v761_v32 }
 0x24e   :  { %v723_v48 = vpop.permute.xlu1 %722 }
 0x24f   :  { %v764_v49 = vmul.f32 %v951_v13, %v723_v48  ;;  %v765_v11 = vmul.f32 %v952_v50, %v723_v48 }
 0x251   :  { %796 = vst [vmem:[%s1634_s5 + $0xc0] sm:$0xff] %v764_v49  ;;  %797 = vst [vmem:[%s1634_s5 + $0xc8] sm:$0xff] %v765_v11 }
 0x252   :  { %v733_v24 = vpop.permute.xlu1 %732 }
 0x253   :  { %v768_v40 = vmul.f32 %v953_v51, %v733_v24  ;;  %v769_v55 = vmul.f32 %v954_v54, %v733_v24 }
 0x255   :  { %800 = vst [vmem:[%s1634_s5 + $0xe0] sm:$0xff] %v768_v40  ;;  %801 = vst [vmem:[%s1634_s5 + $0xe8] sm:$0xff] %v769_v55 }

</bundles_post_ra>
